<compile_context>
chip_gen: v7x
topology: tpu7x:2x2x1
jax: 0.10.0
libtpu: 0.0.40
codegen_flags: <defaults>
</compile_context>

<pallas_src>
import jax
import jax.numpy as jnp
from jax.experimental import pallas as pl
from jax.experimental.pallas import tpu as pltpu


def prepare_params(params):
    """One-time (load-time) parameter prep. NOT on the per-call path.

    Ordering contract (must stay coupled):
      wa columns  = [ model1 | model2 ]   (first-layer weights, bf16)
      wb rows     = [ model1 ; model2 ]   (second-layer weights, f32)
      h scaling   = w0 on columns [0,H),  w1 on columns [H,2H)
    """
    wa = jnp.concatenate([params["w1a"], params["w2a"]], axis=1).astype(jnp.bfloat16)  # (D, 2H)
    ba = jnp.concatenate([params["b1a"], params["b2a"]], axis=1).astype(jnp.float32)   # (1, 2H)
    wb = jnp.concatenate([params["w1b"], params["w2b"]], axis=0).astype(jnp.float32)   # (2H, NC)
    bb = jnp.concatenate([params["b1b"], params["b2b"]], axis=0).astype(jnp.float32)   # (2, NC)
    return {"wa": wa, "ba": ba, "wb": wb, "bb": bb}


def ensemble_kernel(ens_w_ref,   # SMEM (2,)      f32   ensemble weights
                    x_ref,       # VMEM (TB, D)   f32   flattened input tile
                    wa_ref,      # VMEM (D, 2H)   bf16  fused first-layer weights
                    ba_ref,      # VMEM (1, 2H)   f32   fused first-layer bias
                    wb_ref,      # VMEM (2H, NC)  f32   stacked second-layer weights
                    bb_ref,      # VMEM (2, NC)   f32   stacked second-layer biases
                    o_ref):      # VMEM (TB, NC)  f32   ensemble logits
    w0 = ens_w_ref[0]
    w1 = ens_w_ref[1]
    hid = wa_ref.shape[1] // 2

    # In-kernel bf16 cast of x (free under the weight DMA).
    xb = x_ref[...].astype(jnp.bfloat16)

    # Fused first layer of both sub-models: one bf16 (TB,D)x(D,2H) MXU matmul,
    # f32 accumulation.
    h = jnp.dot(xb, wa_ref[...], preferred_element_type=jnp.float32)
    h = jnp.maximum(h + ba_ref[...], 0.0)                         # (TB, 2H) f32

    # Fold the ensemble scalars into h: columns [0,H) -> model1 (w0),
    # columns [H,2H) -> model2 (w1). Lane-aligned split at 128; pure VPU.
    col = jax.lax.broadcasted_iota(jnp.int32, h.shape, 1)
    h = h * jnp.where(col < hid, w0, w1)

    # Single stacked second-layer matmul: the weighted ensemble sum rides in the
    # MXU accumulation. Bias combine is 2*NC VPU flops.
    out = jnp.dot(h, wb_ref[...], preferred_element_type=jnp.float32)
    o_ref[...] = out + (bb_ref[0:1, :] * w0 + bb_ref[1:2, :] * w1)


def rice_leaf_classifier(x, weights, prepped):
    """x: [B, C, H, W] f32, weights: [2] f32, prepped: prepare_params(...) -> [B, NC]."""
    B = x.shape[0]
    wa, ba, wb, bb = prepped["wa"], prepped["ba"], prepped["wb"], prepped["bb"]
    D, two_h = wa.shape
    NC = wb.shape[1]

    # Flatten is a free metadata reshape (no copy); the bf16 cast is in-kernel.
    x_flat = x.reshape(B, D)

    # Batch grid: weights are resident (constant block index), x / out tiles stream.
    # At the demo B=2 this is a single grid point.
    tile_b = B if B <= 256 else 256
    assert B % tile_b == 0, "TODO(synk): pad ragged batches to a tile multiple"
    n_b = B // tile_b

    return pl.pallas_call(
        ensemble_kernel,
        out_shape=jax.ShapeDtypeStruct((B, NC), jnp.float32),
        grid=(n_b,),
        in_specs=[
            pl.BlockSpec(memory_space=pltpu.MemorySpace.SMEM),     # ensemble weights
            pl.BlockSpec((tile_b, D), lambda i: (i, 0)),           # x tile (streams)
            pl.BlockSpec((D, two_h), lambda i: (0, 0)),            # wa (resident)
            pl.BlockSpec((1, two_h), lambda i: (0, 0)),            # ba (resident)
            pl.BlockSpec((two_h, NC), lambda i: (0, 0)),           # wb (resident)
            pl.BlockSpec((2, NC), lambda i: (0, 0)),               # bb (resident)
        ],
        out_specs=pl.BlockSpec((tile_b, NC), lambda i: (i, 0)),
        compiler_params=pltpu.CompilerParams(
            dimension_semantics=("parallel",)),   # shard batch tiles across v7x's 2 TCs
    )(weights, x_flat, wa, ba, wb, bb)


def _reference(x, weights, params):
    """Pure-JAX reference with the same bf16 first-layer precision as the kernel."""
    xf = x.reshape(x.shape[0], -1).astype(jnp.bfloat16)
    w1a = params["w1a"].astype(jnp.bfloat16)
    w2a = params["w2a"].astype(jnp.bfloat16)
    h1 = jnp.maximum(jnp.dot(xf, w1a, preferred_element_type=jnp.float32) + params["b1a"], 0.0)
    h2 = jnp.maximum(jnp.dot(xf, w2a, preferred_element_type=jnp.float32) + params["b2a"], 0.0)
    o1 = h1 @ params["w1b"] + params["b1b"]
    o2 = h2 @ params["w2b"] + params["b2b"]
    return o1 * weights[0] + o2 * weights[1]


if __name__ == "__main__":
    key = jax.random.PRNGKey(0)
    B, C, H, W = 2, 4, 16, 16          # small NCHW input
    D = C * H * W                      # 1024 flattened features
    HID, NC = 128, 16                  # hidden width (MXU-friendly), num classes

    ks = jax.random.split(key, 10)
    x = jax.random.normal(ks[0], (B, C, H, W), jnp.float32)
    weights = jnp.array([0.6, 0.4], dtype=jnp.float32)

    # Deterministic synthetic sub-model parameters (no checkpoint loading).
    params = {
        "w1a": jax.random.normal(ks[1], (D, HID), jnp.float32) * 0.02,
        "b1a": jax.random.normal(ks[2], (1, HID), jnp.float32) * 0.02,
        "w1b": jax.random.normal(ks[3], (HID, NC), jnp.float32) * 0.02,
        "b1b": jax.random.normal(ks[4], (1, NC), jnp.float32) * 0.02,
        "w2a": jax.random.normal(ks[5], (D, HID), jnp.float32) * 0.02,
        "b2a": jax.random.normal(ks[6], (1, HID), jnp.float32) * 0.02,
        "w2b": jax.random.normal(ks[7], (HID, NC), jnp.float32) * 0.02,
        "b2b": jax.random.normal(ks[8], (1, NC), jnp.float32) * 0.02,
    }

    # One-time param prep (load time) — NOT part of the per-call path.
    prepped = prepare_params(params)

    run = jax.jit(rice_leaf_classifier)
    out = jax.block_until_ready(run(x, weights, prepped))

    ref = _reference(x, weights, params)
    assert out.shape == (B, NC)
    assert jnp.allclose(out, ref, atol=1e-3, rtol=1e-3), "mismatch vs JAX reference"

    print("KERNEL_OK")
</pallas_src>

<mosaic_0001>
module attributes {stable_mosaic.version = 11 : i64} {
  func.func @ensemble_kernel(%arg0: i32, %arg1: memref<2xf32, #tpu.memory_space<smem>>, %arg2: memref<2x1024xf32, #tpu.memory_space<vmem>>, %arg3: memref<1024x256xbf16, #tpu.memory_space<vmem>>, %arg4: memref<1x256xf32, #tpu.memory_space<vmem>>, %arg5: memref<256x16xf32, #tpu.memory_space<vmem>>, %arg6: memref<2x16xf32, #tpu.memory_space<vmem>>, %arg7: memref<2x16xf32, #tpu.memory_space<vmem>>) attributes {dimension_semantics = [#tpu.dimension_semantics<parallel>], iteration_bounds = array<i64: 1>, scalar_prefetch = 0 : i64, scratch_operands = 0 : i64, tpu.core_type = #tpu.core_type<tc>, window_params = [{transform_indices = @transform_0, window_bounds = array<i64: 2>}, {transform_indices = @transform_1, window_bounds = array<i64: 2, 1024>}, {pipeline_mode = #tpu.pipeline_mode<synchronous>, transform_indices = @transform_2, window_bounds = array<i64: 1024, 256>}, {pipeline_mode = #tpu.pipeline_mode<synchronous>, transform_indices = @transform_3, window_bounds = array<i64: 1, 256>}, {pipeline_mode = #tpu.pipeline_mode<synchronous>, transform_indices = @transform_4, window_bounds = array<i64: 256, 16>}, {pipeline_mode = #tpu.pipeline_mode<synchronous>, transform_indices = @transform_5, window_bounds = array<i64: 2, 16>}, {transform_indices = @transform_6, window_bounds = array<i64: 2, 16>}]} {
    %c0 = arith.constant 0 : index
    %0 = memref.load %arg1[%c0] : memref<2xf32, #tpu.memory_space<smem>>
    %c1 = arith.constant 1 : index
    %1 = memref.load %arg1[%c1] : memref<2xf32, #tpu.memory_space<smem>>
    %c0_0 = arith.constant 0 : index
    %c0_1 = arith.constant 0 : index
    %2 = vector.load %arg2[%c0_0, %c0_1] : memref<2x1024xf32, #tpu.memory_space<vmem>>, vector<2x1024xf32>
    %3 = arith.truncf %2 : vector<2x1024xf32> to vector<2x1024xbf16>
    %c0_2 = arith.constant 0 : index
    %c0_3 = arith.constant 0 : index
    %4 = vector.load %arg3[%c0_2, %c0_3] : memref<1024x256xbf16, #tpu.memory_space<vmem>>, vector<1024x256xbf16>
    %cst = arith.constant dense<0.000000e+00> : vector<2x256xf32>
    %5 = tpu.matmul %3, %4, %cst {dimension_numbers = #tpu.dot_dimension_numbers<[1], [0], [0], [1], [0, 0, 1, 1], [], []>} : vector<2x1024xbf16>, vector<1024x256xbf16>, vector<2x256xf32> -> vector<2x256xf32>
    %c0_4 = arith.constant 0 : index
    %c0_5 = arith.constant 0 : index
    %6 = vector.load %arg4[%c0_4, %c0_5] : memref<1x256xf32, #tpu.memory_space<vmem>>, vector<1x256xf32>
    %7 = vector.broadcast %6 : vector<1x256xf32> to vector<2x256xf32>
    %8 = arith.addf %5, %7 : vector<2x256xf32>
    %cst_6 = arith.constant 0.000000e+00 : f32
    %9 = vector.broadcast %cst_6 : f32 to vector<2x256xf32>
    %10 = arith.maximumf %8, %9 : vector<2x256xf32>
    %11 = tpu.iota {dimensions = array<i32: 1>} : vector<2x256xi32>
    %c128_i32 = arith.constant 128 : i32
    %12 = vector.broadcast %c128_i32 : i32 to vector<2x256xi32>
    %13 = arith.cmpi slt, %11, %12 : vector<2x256xi32>
    %14 = vector.broadcast %0 : f32 to vector<2x256xf32>
    %15 = vector.broadcast %1 : f32 to vector<2x256xf32>
    %16 = arith.select %13, %14, %15 : vector<2x256xi1>, vector<2x256xf32>
    %17 = arith.mulf %10, %16 : vector<2x256xf32>
    %c0_7 = arith.constant 0 : index
    %c0_8 = arith.constant 0 : index
    %18 = vector.load %arg5[%c0_7, %c0_8] : memref<256x16xf32, #tpu.memory_space<vmem>>, vector<256x16xf32>
    %cst_9 = arith.constant dense<0.000000e+00> : vector<2x16xf32>
    %19 = tpu.matmul %17, %18, %cst_9 {dimension_numbers = #tpu.dot_dimension_numbers<[1], [0], [0], [1], [0, 0, 1, 1], [], []>} : vector<2x256xf32>, vector<256x16xf32>, vector<2x16xf32> -> vector<2x16xf32>
    %c0_10 = arith.constant 0 : index
    %c0_11 = arith.constant 0 : index
    %20 = vector.load %arg6[%c0_10, %c0_11] : memref<2x16xf32, #tpu.memory_space<vmem>>, vector<1x16xf32>
    %21 = vector.broadcast %0 : f32 to vector<1x16xf32>
    %22 = arith.mulf %20, %21 : vector<1x16xf32>
    %c1_12 = arith.constant 1 : index
    %c0_13 = arith.constant 0 : index
    %23 = vector.load %arg6[%c1_12, %c0_13] : memref<2x16xf32, #tpu.memory_space<vmem>>, vector<1x16xf32>
    %24 = vector.broadcast %1 : f32 to vector<1x16xf32>
    %25 = arith.mulf %23, %24 : vector<1x16xf32>
    %26 = arith.addf %22, %25 : vector<1x16xf32>
    %27 = vector.broadcast %26 : vector<1x16xf32> to vector<2x16xf32>
    %28 = arith.addf %19, %27 : vector<2x16xf32>
    %c0_14 = arith.constant 0 : index
    %c0_15 = arith.constant 0 : index
    %29 = vector.load %arg7[%c0_14, %c0_15] : memref<2x16xf32, #tpu.memory_space<vmem>>, vector<2x16xf32>
    tpu.vector_store %arg7[%c0_14, %c0_15], %28 {strides = array<i32>} : memref<2x16xf32, #tpu.memory_space<vmem>>, vector<2x16xf32>,
    return
  }
  func.func @transform_0(%arg0: i32) -> i32 {
    %c0_i32 = arith.constant 0 : i32
    %c0_i32_0 = arith.constant 0 : i32
    return %c0_i32 : i32
  }
  func.func @transform_1(%arg0: i32) -> (i32, i32) {
    %c0_i32 = arith.constant 0 : i32
    %c0_i32_0 = arith.constant 0 : i32
    return %arg0, %c0_i32 : i32, i32
  }
  func.func @transform_2(%arg0: i32) -> (i32, i32) {
    %c0_i32 = arith.constant 0 : i32
    %c0_i32_0 = arith.constant 0 : i32
    %c0_i32_1 = arith.constant 0 : i32
    return %c0_i32, %c0_i32_0 : i32, i32
  }
  func.func @transform_3(%arg0: i32) -> (i32, i32) {
    %c0_i32 = arith.constant 0 : i32
    %c0_i32_0 = arith.constant 0 : i32
    %c0_i32_1 = arith.constant 0 : i32
    return %c0_i32, %c0_i32_0 : i32, i32
  }
  func.func @transform_4(%arg0: i32) -> (i32, i32) {
    %c0_i32 = arith.constant 0 : i32
    %c0_i32_0 = arith.constant 0 : i32
    %c0_i32_1 = arith.constant 0 : i32
    return %c0_i32, %c0_i32_0 : i32, i32
  }
  func.func @transform_5(%arg0: i32) -> (i32, i32) {
    %c0_i32 = arith.constant 0 : i32
    %c0_i32_0 = arith.constant 0 : i32
    %c0_i32_1 = arith.constant 0 : i32
    return %c0_i32, %c0_i32_0 : i32, i32
  }
  func.func @transform_6(%arg0: i32) -> (i32, i32) {
    %c0_i32 = arith.constant 0 : i32
    %c0_i32_0 = arith.constant 0 : i32
    return %arg0, %c0_i32 : i32, i32
  }
}

</mosaic_0001>

<bundles_post_ra>
// kernel: rice_leaf_classifier.1
= control target key start
LH: loop header
LB: loop body
LE: loop exit
PB: predicated region body
PF: predicated region fallthrough
CT: control target
= control target key end

     0   :  { %11 = vsyncpa [#allocation5], 0  ;;  %s1865_s0 = inlined_call_operand.vmem [shape: f32[2], index: 0, kind: input, shape index: {}]   ;;  %s1866_s1 = inlined_call_operand.vmem [shape: f32[2,1024], index: 1, kind: input, shape index: {}]   ;;  %s1867_s2 = inlined_call_operand.hbm [shape: bf16[1024,256], index: 2, kind: input, shape index: {}]   ;;  %s1868_s3 = inlined_call_operand.vmem [shape: f32[1,256], index: 3, kind: input, shape index: {}]   ;;  %s1869_s4 = inlined_call_operand.vmem [shape: f32[256,16], index: 4, kind: input, shape index: {}]   ;;  %s1870_s5 = inlined_call_operand.vmem [shape: f32[2,16], index: 5, kind: input, shape index: {}]   ;;  %s1871_s6 = inlined_call_operand.hbm [shape: f32[2,16], index: 6, kind: output, shape index: {}]  }
   0x1   :  { %12 = vsyncpa [#allocation3], 0 }
   0x2   :  { %13 = vsyncpa [#allocation4], 0  ;;  %s20_s23 = sshll.u32 %s1865_s0, 4  ;;  %s21_s23 = int_to_ptr.vmem [resolvable:$true] %s20_s23 }
   0x3   :  { %s1601_s24 = scalar_lea.vmem %s21_s23, 16  ;;  %p1606_p1 = scmp.lt.s32.totalorder %s21_s23, %s21_s23 }
   0x4   :  { %p1602_p0 = scmp.ne.s32.totalorder %s21_s23, %s1601_s24  ;;  %p1607_p2 = scmp.lt.s32.totalorder %s1601_s24, %s1601_s24 }
   0x6   :  { %p1608_p3 = por %p1607_p2, %p1606_p1 }
   0x8   :  { %p1609_p4 = pnand %p1608_p3, %p1602_p0 }
   0xa   :  { %1612 = shalt.err (!%p1609_p4)
}
   0xb   :  { %s1663_s25 = smov [#allocation2]   ;;  %s1664_s26 = smov [#allocation6]  }
   0xc   :  { %23 = dma.vmem_to_smem %s21_s23, 16, %s1663_s25, [#allocation5]  }
   0xd   :  { %s31_s27 = sshll.u32 %s1664_s26, 4  ;;  %s1613_s30 = scalar_lea.hbm %s1867_s2, 16384  ;;  %s32_s27 = int_to_ptr.vmem [resolvable:$true] %s31_s27 }
   0xe   :  { %p1614_p5 = scmp.ne.s32.totalorder %s1867_s2, %s1613_s30  ;;  %p1617_p6 = scmp.lt.u32.totalorder %s1613_s30, %s1867_s2 }
  0x10   :  { %p1619_p7 = pnand %p1617_p6, %p1614_p5 }
  0x12   :  { %1622 = shalt.err (!%p1619_p7)
}
  0x13   :  { %s1623_s10 = scalar_lea.vmem %s32_s27, 16384  ;;  %p1628_p9 = scmp.lt.s32.totalorder %s32_s27, %s32_s27 }
  0x14   :  { %p1624_p8 = scmp.ne.s32.totalorder %s32_s27, %s1623_s10  ;;  %p1629_p10 = scmp.lt.s32.totalorder %s1623_s10, %s1623_s10 }
  0x16   :  { %p1630_p11 = por %p1629_p10, %p1628_p9 }
  0x18   :  { %p1631_p12 = pnand %p1630_p11, %p1624_p8 }
  0x1a   :  { %1634 = shalt.err (!%p1631_p12)
}
  0x1b   :  { %s1665_s11 = smov 128   ;;  %s1666_s12 = smov 8  }
  0x1c   :  { %37 = dma.hbm_to_vmem [thread:$0]  %s1867_s2, 16384, %s32_s27, [#allocation3], %s1665_s11, %s1665_s11, %s1666_s12  }
  0x1d   :  { %1657 = dma.done.wait [#allocation5], 16  }
  0x1e   :  { %1658 = vsyncadd [#allocation5], 4294967280 }
  0x1f   :  { %1659 = dma.done.wait [#allocation3], 16384  }
  0x20   :  { %1660 = vsyncadd [#allocation3], 4294950912 }
  0x21   :  { %50 = sfence }
  0x22   :  { %v1407_v0 = vld [vmem:[#allocation6 + $0x4] ss:$8 sps:$4 sm:$0xff]   ;;  %v1411_v2 = vld [vmem:[#allocation6] ss:$8 sps:$4 sm:$0xff]   ;;  %v1413_v4 = vld [vmem:[#allocation6 + $0x14] ss:$8 sps:$4 sm:$0xff]   ;;  %v61_v38 = vlaneseq }
  0x23   :  { %v1409_v1 = vld [vmem:[#allocation6 + $0x204] ss:$8 sps:$4 sm:$0xff]   ;;  %887 = vmatprep.subr.bf16.mxu1 %v1407_v0  ;;  %v1412_v3 = vld [vmem:[#allocation6 + $0x200] ss:$8 sps:$4 sm:$0xff]   ;;  %v1415_v5 = vld [vmem:[#allocation6 + $0x214] ss:$8 sps:$4 sm:$0xff]  }
  0x24   :  { %969 = vmatprep.subr.bf16.mxu0 %v1409_v1  ;;  %888 = vmatpush1.bf16.msra.mxu1 %v1411_v2  ;;  %v1417_v6 = vld [vmem:[#allocation6 + $0x10] ss:$8 sps:$4 sm:$0xff]   ;;  %v1419_v8 = vld [vmem:[#allocation6 + $0x24] ss:$8 sps:$4 sm:$0xff]   ;;  %v1423_v10 = vld [vmem:[#allocation6 + $0x20] ss:$8 sps:$4 sm:$0xff]  }
  0x25   :  { %970 = vmatpush1.bf16.msra.mxu0 %v1412_v3  ;;  %889 = vmatprep.subr.bf16.mxu1 %v1413_v4  ;;  %v1418_v7 = vld [vmem:[#allocation6 + $0x210] ss:$8 sps:$4 sm:$0xff]   ;;  %v1421_v9 = vld [vmem:[#allocation6 + $0x224] ss:$8 sps:$4 sm:$0xff]   ;;  %v1424_v11 = vld [vmem:[#allocation6 + $0x220] ss:$8 sps:$4 sm:$0xff]  }
  0x26   :  { %971 = vmatprep.subr.bf16.mxu0 %v1415_v5  ;;  %v1425_v12 = vld [vmem:[#allocation6 + $0x34] ss:$8 sps:$4 sm:$0xff]   ;;  %v1429_v14 = vld [vmem:[#allocation6 + $0x30] ss:$8 sps:$4 sm:$0xff]   ;;  %v1431_v16 = vld [vmem:[#allocation6 + $0x44] ss:$8 sps:$4 sm:$0xff]  }
  0x27   :  { %v1427_v13 = vld [vmem:[#allocation6 + $0x234] ss:$8 sps:$4 sm:$0xff]   ;;  %v1430_v15 = vld [vmem:[#allocation6 + $0x230] ss:$8 sps:$4 sm:$0xff]   ;;  %v1433_v17 = vld [vmem:[#allocation6 + $0x244] ss:$8 sps:$4 sm:$0xff]  }
  0x28   :  { %890 = vmatpush1.bf16.msra.mxu1 %v1417_v6  ;;  %v1435_v18 = vld [vmem:[#allocation6 + $0x40] ss:$8 sps:$4 sm:$0xff]   ;;  %v1437_v20 = vld [vmem:[#allocation6 + $0x54] ss:$8 sps:$4 sm:$0xff]   ;;  %v1441_v22 = vld [vmem:[#allocation6 + $0x50] ss:$8 sps:$4 sm:$0xff]  }
  0x29   :  { %972 = vmatpush1.bf16.msra.mxu0 %v1418_v7  ;;  %891 = vmatprep.subr.bf16.mxu1 %v1419_v8  ;;  %v1436_v19 = vld [vmem:[#allocation6 + $0x240] ss:$8 sps:$4 sm:$0xff]   ;;  %v1439_v21 = vld [vmem:[#allocation6 + $0x254] ss:$8 sps:$4 sm:$0xff]   ;;  %v1442_v23 = vld [vmem:[#allocation6 + $0x250] ss:$8 sps:$4 sm:$0xff]  }
  0x2a   :  { %973 = vmatprep.subr.bf16.mxu0 %v1421_v9  ;;  %v1443_v24 = vld [vmem:[#allocation6 + $0x64] ss:$8 sps:$4 sm:$0xff]   ;;  %v1447_v26 = vld [vmem:[#allocation6 + $0x60] ss:$8 sps:$4 sm:$0xff]   ;;  %v1449_v28 = vld [vmem:[#allocation6 + $0x74] ss:$8 sps:$4 sm:$0xff]  }
  0x2b   :  { %v1445_v25 = vld [vmem:[#allocation6 + $0x264] ss:$8 sps:$4 sm:$0xff]   ;;  %v1448_v27 = vld [vmem:[#allocation6 + $0x260] ss:$8 sps:$4 sm:$0xff]   ;;  %v1451_v29 = vld [vmem:[#allocation6 + $0x274] ss:$8 sps:$4 sm:$0xff]  }
  0x2c   :  { %892 = vmatpush1.bf16.msra.mxu1 %v1423_v10  ;;  %v1453_v30 = vld [vmem:[#allocation6 + $0x70] ss:$8 sps:$4 sm:$0xff]   ;;  %v1455_v32 = vld [vmem:[#allocation6 + $0x84] ss:$8 sps:$4 sm:$0xff]   ;;  %v1459_v34 = vld [vmem:[#allocation6 + $0x80] ss:$8 sps:$4 sm:$0xff]  }
  0x2d   :  { %974 = vmatpush1.bf16.msra.mxu0 %v1424_v11  ;;  %893 = vmatprep.subr.bf16.mxu1 %v1425_v12  ;;  %v1454_v31 = vld [vmem:[#allocation6 + $0x270] ss:$8 sps:$4 sm:$0xff]   ;;  %v1457_v33 = vld [vmem:[#allocation6 + $0x284] ss:$8 sps:$4 sm:$0xff]   ;;  %v1460_v35 = vld [vmem:[#allocation6 + $0x280] ss:$8 sps:$4 sm:$0xff]  }
  0x2e   :  { %975 = vmatprep.subr.bf16.mxu0 %v1427_v13  ;;  %v1667_v36 = vmov 1983009808   ;;  %v1461_v39 = vld [vmem:[#allocation6 + $0x94] ss:$8 sps:$4 sm:$0xff]   ;;  %v1465_v41 = vld [vmem:[#allocation6 + $0x90] ss:$8 sps:$4 sm:$0xff]  }
  0x2f   :  { %v59_v37 = vunpack.c.l.s4 %v1667_v36  ;;  %v1463_v40 = vld [vmem:[#allocation6 + $0x294] ss:$8 sps:$4 sm:$0xff]   ;;  %v1719_v43 = vshrl.u32 %v61_v38, 7  ;;  %v1466_v44 = vld [vmem:[#allocation6 + $0x290] ss:$8 sps:$4 sm:$0xff]   ;;  %v53_v52 = vld [vmem:[%s1866_s1] sm:$0xff] }
  0x30   :  { %894 = vmatpush1.bf16.msra.mxu1 %v1429_v14  ;;  %v1467_v45 = vld [vmem:[#allocation6 + $0xa4] ss:$8 sps:$4 sm:$0xff]   ;;  %v1471_v47 = vld [vmem:[#allocation6 + $0xa0] ss:$8 sps:$4 sm:$0xff]   ;;  %v1473_v50 = vld [vmem:[#allocation6 + $0xb4] ss:$8 sps:$4 sm:$0xff]   ;;  %v57_v8 = vcombine.high %v53_v52, %v53_v52 }
  0x31   :  { %976 = vmatpush1.bf16.msra.mxu0 %v1430_v15  ;;  %895 = vmatprep.subr.bf16.mxu1 %v1431_v16  ;;  %v60_v42 = vunpack.c.0.s8 %v59_v37  ;;  %v1469_v46 = vld [vmem:[#allocation6 + $0x2a4] ss:$8 sps:$4 sm:$0xff]   ;;  %v1472_v48 = vld [vmem:[#allocation6 + $0x2a0] ss:$8 sps:$4 sm:$0xff]   ;;  %v1475_v51 = vld [vmem:[#allocation6 + $0x2b4] ss:$8 sps:$4 sm:$0xff]  }
  0x32   :  { %977 = vmatprep.subr.bf16.mxu0 %v1433_v17  ;;  %v1477_v53 = vld [vmem:[#allocation6 + $0xb0] ss:$8 sps:$4 sm:$0xff]   ;;  %v54_v56 = vld [vmem:[%s1866_s1 + $0x8] sm:$0xff]  ;;  %v1485_v1 = vld [vmem:[#allocation6 + $0xd4] ss:$8 sps:$4 sm:$0xff]   ;;  %s1193_s29 = sld [smem:[#allocation2 + $0x1]] }
  0x33   :  { %v63_v49 = vsub.s32 %v60_v42, %v1719_v43  ;;  %v1478_v55 = vld [vmem:[#allocation6 + $0x2b0] ss:$8 sps:$4 sm:$0xff]   ;;  %v1479_v57 = vld [vmem:[#allocation6 + $0xc4] ss:$8 sps:$4 sm:$0xff]   ;;  %v1483_v63 = vld [vmem:[#allocation6 + $0xc0] ss:$8 sps:$4 sm:$0xff]   ;;  %v74_v9 = vcombine.high %v54_v56, %v54_v56 }
  0x34   :  { %896 = vmatpush1.bf16.msra.mxu1 %v1435_v18  ;;  %v1481_v58 = vld [vmem:[#allocation6 + $0x2c4] ss:$8 sps:$4 sm:$0xff]   ;;  %v1484_v0 = vld [vmem:[#allocation6 + $0x2c0] ss:$8 sps:$4 sm:$0xff]   ;;  %v1487_v2 = vld [vmem:[#allocation6 + $0x2d4] ss:$8 sps:$4 sm:$0xff]  }
  0x35   :  { %978 = vmatpush1.bf16.msra.mxu0 %v1436_v19  ;;  %897 = vmatprep.subr.bf16.mxu1 %v1437_v20  ;;  %v1725_v54 = vrot.slane %v53_v52, %v63_v49  ;;  %v81_v60 = vrot.slane %v54_v56, %v63_v49  ;;  %v1489_v4 = vld [vmem:[#allocation6 + $0xd0] ss:$8 sps:$4 sm:$0xff]   ;;  %v1491_v6 = vld [vmem:[#allocation6 + $0xe4] ss:$8 sps:$4 sm:$0xff]   ;;  %v1495_v10 = vld [vmem:[#allocation6 + $0xe0] ss:$8 sps:$4 sm:$0xff]   ;;  %v1732_v14 = vrot.slane %v57_v8, %v63_v49 }
  0x36   :  { %979 = vmatprep.subr.bf16.mxu0 %v1439_v21  ;;  %v1490_v5 = vld [vmem:[#allocation6 + $0x2d0] ss:$8 sps:$4 sm:$0xff]   ;;  %v1493_v7 = vld [vmem:[#allocation6 + $0x2e4] ss:$8 sps:$4 sm:$0xff]   ;;  %v1496_v11 = vld [vmem:[#allocation6 + $0x2e0] ss:$8 sps:$4 sm:$0xff]   ;;  %v1734_v15 = vrot.slane %v74_v9, %v63_v49 }
  0x37   :  { %v72_v59 = vcombine.high %v1725_v54, %v1725_v54  ;;  %v89_v62 = vcombine.high %v81_v60, %v81_v60  ;;  %v1497_v12 = vld [vmem:[#allocation6 + $0xf4] ss:$8 sps:$4 sm:$0xff]   ;;  %v1501_v16 = vld [vmem:[#allocation6 + $0xf0] ss:$8 sps:$4 sm:$0xff]   ;;  %v1506_v18 = vld [vmem:[#allocation6 + $0x104] ss:$8 sps:$4 sm:$0xff]   ;;  %v73_v20 = vcombine.high %v1732_v14, %v1732_v14 }
  0x38   :  { %898 = vmatpush1.bf16.msra.mxu1 %v1441_v22  ;;  %v1499_v13 = vld [vmem:[#allocation6 + $0x2f4] ss:$8 sps:$4 sm:$0xff]   ;;  %v1502_v17 = vld [vmem:[#allocation6 + $0x2f0] ss:$8 sps:$4 sm:$0xff]   ;;  %v1510_v19 = vld [vmem:[#allocation6 + $0x304] ss:$8 sps:$4 sm:$0xff]   ;;  %v90_v21 = vcombine.high %v1734_v15, %v1734_v15  ;;  %v99_v22 = vpack.c.bf16 %v1725_v54, %v1725_v54 }
  0x39   :  { %980 = vmatpush1.bf16.msra.mxu0 %v1442_v23  ;;  %899 = vmatprep.subr.bf16.mxu1 %v1443_v24  ;;  %v100_v61 = vpack.c.bf16 %v72_v59, %v72_v59  ;;  %v104_v3 = vpack.c.bf16 %v89_v62, %v89_v62  ;;  %v103_v23 = vpack.c.bf16 %v81_v60, %v81_v60  ;;  %v1504_v24 = vld [vmem:[#allocation6 + $0x100] ss:$8 sps:$4 sm:$0xff]   ;;  %v1525_v36 = vld [vmem:[#allocation6 + $0x134] ss:$8 sps:$4 sm:$0xff]   ;;  %v1523_v38 = vld [vmem:[#allocation6 + $0x130] ss:$8 sps:$4 sm:$0xff]  }
  0x3a   :  { %981 = vmatprep.subr.bf16.mxu0 %v1445_v25  ;;  %v1508_v25 = vld [vmem:[#allocation6 + $0x300] ss:$8 sps:$4 sm:$0xff]   ;;  %v1528_v37 = vld [vmem:[#allocation6 + $0x334] ss:$8 sps:$4 sm:$0xff]   ;;  %v1543_v49 = vld [vmem:[#allocation6 + $0x164] ss:$8 sps:$4 sm:$0xff]  }
  0x3b   :  { %919 = vmatprep.mubr.bf16.mxu1 %v100_v61  ;;  %1001 = vmatprep.mubr.bf16.mxu0 %v104_v3  ;;  %v1529_v42 = vld [vmem:[#allocation6 + $0x140] ss:$8 sps:$4 sm:$0xff]   ;;  %v1552_v54 = vld [vmem:[#allocation6 + $0x374] ss:$8 sps:$4 sm:$0xff]   ;;  %v1550_v56 = vld [vmem:[#allocation6 + $0x370] ss:$8 sps:$4 sm:$0xff]  }
  0x3c   :  { %900 = vmatpush1.bf16.msra.mxu1 %v1447_v26  ;;  %v1513_v26 = vld [vmem:[#allocation6 + $0x114] ss:$8 sps:$4 sm:$0xff]   ;;  %v1544_v52 = vld [vmem:[#allocation6 + $0x360] ss:$8 sps:$4 sm:$0xff]   ;;  %v1574_v8 = vld [vmem:[#allocation6 + $0x3b0] ss:$8 sps:$4 sm:$0xff]  }
  0x3d   :  { %982 = vmatpush1.bf16.msra.mxu0 %v1448_v27  ;;  %901 = vmatprep.subr.bf16.mxu1 %v1449_v28  ;;  %v1516_v27 = vld [vmem:[#allocation6 + $0x314] ss:$8 sps:$4 sm:$0xff]   ;;  %v102_v28 = vpack.c.bf16 %v73_v20, %v73_v20  ;;  %v1553_v59 = vld [vmem:[#allocation6 + $0x180] ss:$8 sps:$4 sm:$0xff]   ;;  %v1579_v9 = vld [vmem:[#allocation6 + $0x1c4] ss:$8 sps:$4 sm:$0xff]  }
  0x3e   :  { %983 = vmatprep.subr.bf16.mxu0 %v1451_v29  ;;  %v106_v29 = vpack.c.bf16 %v90_v21, %v90_v21  ;;  %v1556_v60 = vld [vmem:[#allocation6 + $0x380] ss:$8 sps:$4 sm:$0xff]   ;;  %v1561_v61 = vld [vmem:[#allocation6 + $0x194] ss:$8 sps:$4 sm:$0xff]   ;;  %v1594_v20 = vld [vmem:[#allocation6 + $0x3e4] ss:$8 sps:$4 sm:$0xff]  }
  0x3f   :  { %v1564_v62 = vld [vmem:[#allocation6 + $0x394] ss:$8 sps:$4 sm:$0xff]   ;;  %v1565_v3 = vld [vmem:[#allocation6 + $0x1a0] ss:$8 sps:$4 sm:$0xff]   ;;  %s51_s30 = sld [smem:[#allocation2]]  ;;  %s1668_s0 = smov [#allocation7]  }
  0x40   :  { %902 = vmatpush1.bf16.msra.mxu1 %v1453_v30  ;;  %v1511_v30 = vld [vmem:[#allocation6 + $0x110] ss:$8 sps:$4 sm:$0xff]   ;;  %v1589_v21 = vld [vmem:[#allocation6 + $0x1e0] ss:$8 sps:$4 sm:$0xff]   ;;  %s1183_s9 = sshll.u32 %s1668_s0, 4  ;;  %vm1175_vm0 = vcmask 123904   ;;  %s1184_s9 = int_to_ptr.vmem [resolvable:$true] %s1183_s9 }
  0x41   :  { %984 = vmatpush1.bf16.msra.mxu0 %v1454_v31  ;;  %903 = vmatprep.subr.bf16.mxu1 %v1455_v32  ;;  %v1514_v31 = vld [vmem:[#allocation6 + $0x310] ss:$8 sps:$4 sm:$0xff]   ;;  %v1519_v32 = vld [vmem:[#allocation6 + $0x124] ss:$8 sps:$4 sm:$0xff]   ;;  %s1635_s10 = scalar_lea.vmem %s1184_s9, 32  ;;  %p1640_p0 = scmp.lt.s32.totalorder %s1184_s9, %s1184_s9 }
  0x42   :  { %985 = vmatprep.subr.bf16.mxu0 %v1457_v33  ;;  %v1522_v33 = vld [vmem:[#allocation6 + $0x324] ss:$8 sps:$4 sm:$0xff]   ;;  %p1636_p13 = scmp.ne.s32.totalorder %s1184_s9, %s1635_s10  ;;  %p1641_p1 = scmp.lt.s32.totalorder %s1635_s10, %s1635_s10 }
  0x44   :  { %904 = vmatpush1.bf16.msra.mxu1 %v1459_v34  ;;  %v1517_v34 = vld [vmem:[#allocation6 + $0x120] ss:$8 sps:$4 sm:$0xff]   ;;  %p1642_p2 = por %p1641_p1, %p1640_p0 }
  0x45   :  { %986 = vmatpush1.bf16.msra.mxu0 %v1460_v35  ;;  %905 = vmatprep.subr.bf16.mxu1 %v1461_v39  ;;  %v1520_v35 = vld [vmem:[#allocation6 + $0x320] ss:$8 sps:$4 sm:$0xff]   ;;  %v1526_v39 = vld [vmem:[#allocation6 + $0x330] ss:$8 sps:$4 sm:$0xff]  }
  0x46   :  { %987 = vmatprep.subr.bf16.mxu0 %v1463_v40  ;;  %v1531_v40 = vld [vmem:[#allocation6 + $0x144] ss:$8 sps:$4 sm:$0xff]   ;;  %p1643_p3 = pnand %p1642_p2, %p1636_p13 }
  0x48   :  { %906 = vmatpush1.bf16.msra.mxu1 %v1465_v41  ;;  %v1534_v41 = vld [vmem:[#allocation6 + $0x344] ss:$8 sps:$4 sm:$0xff]  }
  0x49   :  { %988 = vmatpush1.bf16.msra.mxu0 %v1466_v44  ;;  %907 = vmatprep.subr.bf16.mxu1 %v1467_v45  ;;  %v1532_v44 = vld [vmem:[#allocation6 + $0x340] ss:$8 sps:$4 sm:$0xff]   ;;  %v1537_v45 = vld [vmem:[#allocation6 + $0x154] ss:$8 sps:$4 sm:$0xff]  }
  0x4a   :  { %989 = vmatprep.subr.bf16.mxu0 %v1469_v46  ;;  %v1540_v46 = vld [vmem:[#allocation6 + $0x354] ss:$8 sps:$4 sm:$0xff]  }
  0x4c   :  { %908 = vmatpush1.bf16.msra.mxu1 %v1471_v47  ;;  %v1535_v47 = vld [vmem:[#allocation6 + $0x150] ss:$8 sps:$4 sm:$0xff]  }
  0x4d   :  { %990 = vmatpush1.bf16.msra.mxu0 %v1472_v48  ;;  %909 = vmatprep.subr.bf16.mxu1 %v1473_v50  ;;  %v1538_v48 = vld [vmem:[#allocation6 + $0x350] ss:$8 sps:$4 sm:$0xff]   ;;  %v1546_v50 = vld [vmem:[#allocation6 + $0x364] ss:$8 sps:$4 sm:$0xff]  }
  0x4e   :  { %991 = vmatprep.subr.bf16.mxu0 %v1475_v51  ;;  %v1541_v51 = vld [vmem:[#allocation6 + $0x160] ss:$8 sps:$4 sm:$0xff]  }
  0x50   :  { %910 = vmatpush1.bf16.msra.mxu1 %v1477_v53  ;;  %v1549_v53 = vld [vmem:[#allocation6 + $0x174] ss:$8 sps:$4 sm:$0xff]  }
  0x51   :  { %992 = vmatpush1.bf16.msra.mxu0 %v1478_v55  ;;  %911 = vmatprep.subr.bf16.mxu1 %v1479_v57  ;;  %v1547_v55 = vld [vmem:[#allocation6 + $0x170] ss:$8 sps:$4 sm:$0xff]   ;;  %v1555_v57 = vld [vmem:[#allocation6 + $0x184] ss:$8 sps:$4 sm:$0xff]  }
  0x52   :  { %993 = vmatprep.subr.bf16.mxu0 %v1481_v58  ;;  %v1558_v58 = vld [vmem:[#allocation6 + $0x384] ss:$8 sps:$4 sm:$0xff]  }
  0x54   :  { %912 = vmatpush1.bf16.msra.mxu1 %v1483_v63  ;;  %v1559_v63 = vld [vmem:[#allocation6 + $0x190] ss:$8 sps:$4 sm:$0xff]  }
  0x55   :  { %994 = vmatpush1.bf16.msra.mxu0 %v1484_v0  ;;  %913 = vmatprep.subr.bf16.mxu1 %v1485_v1  ;;  %v1562_v0 = vld [vmem:[#allocation6 + $0x390] ss:$8 sps:$4 sm:$0xff]   ;;  %v1567_v1 = vld [vmem:[#allocation6 + $0x1a4] ss:$8 sps:$4 sm:$0xff]  }
  0x56   :  { %995 = vmatprep.subr.bf16.mxu0 %v1487_v2  ;;  %v1570_v2 = vld [vmem:[#allocation6 + $0x3a4] ss:$8 sps:$4 sm:$0xff]  }
  0x58   :  { %914 = vmatpush1.bf16.msra.mxu1 %v1489_v4  ;;  %v1568_v4 = vld [vmem:[#allocation6 + $0x3a0] ss:$8 sps:$4 sm:$0xff]  }
  0x59   :  { %996 = vmatpush1.bf16.msra.mxu0 %v1490_v5  ;;  %915 = vmatprep.subr.bf16.mxu1 %v1491_v6  ;;  %v1573_v5 = vld [vmem:[#allocation6 + $0x1b4] ss:$8 sps:$4 sm:$0xff]  }
  0x5a   :  { %997 = vmatprep.subr.bf16.mxu0 %v1493_v7  ;;  %v1576_v6 = vld [vmem:[#allocation6 + $0x3b4] ss:$8 sps:$4 sm:$0xff]   ;;  %v1571_v7 = vld [vmem:[#allocation6 + $0x1b0] ss:$8 sps:$4 sm:$0xff]  }
  0x5c   :  { %916 = vmatpush1.bf16.msra.mxu1 %v1495_v10  ;;  %v1582_v10 = vld [vmem:[#allocation6 + $0x3c4] ss:$8 sps:$4 sm:$0xff]  }
  0x5d   :  { %998 = vmatpush1.bf16.msra.mxu0 %v1496_v11  ;;  %917 = vmatprep.subr.bf16.mxu1 %v1497_v12  ;;  %v1577_v11 = vld [vmem:[#allocation6 + $0x1c0] ss:$8 sps:$4 sm:$0xff]  }
  0x5e   :  { %999 = vmatprep.subr.bf16.mxu0 %v1499_v13  ;;  %v1580_v12 = vld [vmem:[#allocation6 + $0x3c0] ss:$8 sps:$4 sm:$0xff]   ;;  %v1585_v13 = vld [vmem:[#allocation6 + $0x1d4] ss:$8 sps:$4 sm:$0xff]  }
  0x60   :  { %918 = vmatpush1.bf16.msra.mxu1 %v1501_v16  ;;  %v1588_v16 = vld [vmem:[#allocation6 + $0x3d4] ss:$8 sps:$4 sm:$0xff]  }
  0x61   :  { %1000 = vmatpush1.bf16.msra.mxu0 %v1502_v17  ;;  %928 = vmatprep.subr.bf16.mxu1 %v1506_v18  ;;  %v1583_v17 = vld [vmem:[#allocation6 + $0x1d0] ss:$8 sps:$4 sm:$0xff]  }
  0x62   :  { %1010 = vmatprep.subr.bf16.mxu0 %v1510_v19  ;;  %v1586_v18 = vld [vmem:[#allocation6 + $0x3d0] ss:$8 sps:$4 sm:$0xff]   ;;  %v1591_v19 = vld [vmem:[#allocation6 + $0x1e4] ss:$8 sps:$4 sm:$0xff]  }
  0x63   :  { %920 = vmatmul.mubr.bf16.vlgmr.msra.gmra.mrb[0].mxu1 %v99_v22  ;;  %v1592_v22 = vld [vmem:[#allocation6 + $0x3e0] ss:$8 sps:$4 sm:$0xff]  }
  0x64   :  { %1002 = vmatmul.mubr.bf16.vlgmr.msra.gmra.mrb[0].mxu0 %v103_v23  ;;  %929 = vmatpush1.bf16.msra.mxu1 %v1504_v24  ;;  %v1597_v23 = vld [vmem:[#allocation6 + $0x1f4] ss:$8 sps:$4 sm:$0xff]  }
  0x65   :  { %1011 = vmatpush1.bf16.msra.mxu0 %v1508_v25  ;;  %930 = vmatprep.subr.bf16.mxu1 %v1513_v26  ;;  %v1600_v24 = vld [vmem:[#allocation6 + $0x3f4] ss:$8 sps:$4 sm:$0xff]   ;;  %v1080_v25 = vld [vmem:[%s1869_s4 + $0x80] sm:$0xff]  ;;  %v1081_v26 = vld [vmem:[%s1869_s4 + $0x88] sm:$0xff] }
  0x66   :  { %1012 = vmatprep.subr.bf16.mxu0 %v1516_v27  ;;  %960 = vmatprep.mubr.bf16.mxu1 %v102_v28  ;;  %v1595_v27 = vld [vmem:[#allocation6 + $0x1f0] ss:$8 sps:$4 sm:$0xff]  }
  0x67   :  { %1042 = vmatprep.mubr.bf16.mxu0 %v106_v29  ;;  %v1598_v28 = vld [vmem:[#allocation6 + $0x3f0] ss:$8 sps:$4 sm:$0xff]   ;;  %v1357_v29 = vpack.c.bf16 %v1081_v26, %v1080_v25 }
  0x68   :  { %931 = vmatpush1.bf16.msra.mxu1 %v1511_v30  ;;  %v1064_v30 = vld [vmem:[%s1869_s4] sm:$0xff] }
  0x69   :  { %1013 = vmatpush1.bf16.msra.mxu0 %v1514_v31  ;;  %932 = vmatprep.subr.bf16.mxu1 %v1519_v32  ;;  %v1065_v31 = vld [vmem:[%s1869_s4 + $0x8] sm:$0xff]  ;;  %v1082_v32 = vld [vmem:[%s1869_s4 + $0x90] sm:$0xff] }
  0x6a   :  { %1014 = vmatprep.subr.bf16.mxu0 %v1522_v33  ;;  %v1083_v33 = vld [vmem:[%s1869_s4 + $0x98] sm:$0xff] }
  0x6c   :  { %933 = vmatpush1.bf16.msra.mxu1 %v1517_v34  ;;  %v101_v34 = vpack.c.bf16 %v1732_v14, %v1732_v14  ;;  %v1084_v14 = vld [vmem:[%s1869_s4 + $0xa0] sm:$0xff] }
  0x6d   :  { %1015 = vmatpush1.bf16.msra.mxu0 %v1520_v35  ;;  %934 = vmatprep.subr.bf16.mxu1 %v1525_v36  ;;  %v105_v35 = vpack.c.bf16 %v1734_v15, %v1734_v15  ;;  %v1359_v36 = vpack.c.bf16 %v1065_v31, %v1064_v30  ;;  %v1085_v15 = vld [vmem:[%s1869_s4 + $0xa8] sm:$0xff] }
  0x6e   :  { %1016 = vmatprep.subr.bf16.mxu0 %v1528_v37  ;;  %v1361_v37 = vpack.c.bf16 %v1083_v33, %v1082_v32  ;;  %v1059_v32 = vstv %s1193_s29  ;;  %v1058_v33 = vstv %s51_s30 }
  0x70   :  { %935 = vmatpush1.bf16.msra.mxu1 %v1523_v38  ;;  %v1066_v38 = vld [vmem:[%s1869_s4 + $0x10] sm:$0xff] }
  0x71   :  { %1017 = vmatpush1.bf16.msra.mxu0 %v1526_v39  ;;  %936 = vmatprep.subr.bf16.mxu1 %v1531_v40  ;;  %v1067_v39 = vld [vmem:[%s1869_s4 + $0x18] sm:$0xff] }
  0x72   :  { %1018 = vmatprep.subr.bf16.mxu0 %v1534_v41  ;;  %v1363_v40 = vpack.c.bf16 %v1067_v39, %v1066_v38  ;;  %v1365_v41 = vpack.c.bf16 %v1085_v15, %v1084_v14 }
  0x74   :  { %937 = vmatpush1.bf16.msra.mxu1 %v1529_v42  ;;  %v1068_v42 = vld [vmem:[%s1869_s4 + $0x20] sm:$0xff] }
  0x75   :  { %1019 = vmatpush1.bf16.msra.mxu0 %v1532_v44  ;;  %938 = vmatprep.subr.bf16.mxu1 %v1537_v45  ;;  %v1069_v44 = vld [vmem:[%s1869_s4 + $0x28] sm:$0xff]  ;;  %v1086_v45 = vld [vmem:[%s1869_s4 + $0xb0] sm:$0xff] }
  0x76   :  { %1020 = vmatprep.subr.bf16.mxu0 %v1540_v46  ;;  %v1087_v46 = vld [vmem:[%s1869_s4 + $0xb8] sm:$0xff] }
  0x78   :  { %939 = vmatpush1.bf16.msra.mxu1 %v1535_v47  ;;  %v1367_v47 = vpack.c.bf16 %v1069_v44, %v1068_v42 }
  0x79   :  { %1021 = vmatpush1.bf16.msra.mxu0 %v1538_v48  ;;  %940 = vmatprep.subr.bf16.mxu1 %v1543_v49  ;;  %v1369_v48 = vpack.c.bf16 %v1087_v46, %v1086_v45  ;;  %v1070_v49 = vld [vmem:[%s1869_s4 + $0x30] sm:$0xff] }
  0x7a   :  { %1022 = vmatprep.subr.bf16.mxu0 %v1546_v50  ;;  %v1071_v50 = vld [vmem:[%s1869_s4 + $0x38] sm:$0xff] }
  0x7c   :  { %941 = vmatpush1.bf16.msra.mxu1 %v1541_v51  ;;  %v1088_v51 = vld [vmem:[%s1869_s4 + $0xc0] sm:$0xff] }
  0x7d   :  { %1023 = vmatpush1.bf16.msra.mxu0 %v1544_v52  ;;  %942 = vmatprep.subr.bf16.mxu1 %v1549_v53  ;;  %v1089_v52 = vld [vmem:[%s1869_s4 + $0xc8] sm:$0xff]  ;;  %v1371_v53 = vpack.c.bf16 %v1071_v50, %v1070_v49 }
  0x7e   :  { %1024 = vmatprep.subr.bf16.mxu0 %v1552_v54  ;;  %v1373_v54 = vpack.c.bf16 %v1089_v52, %v1088_v51 }
  0x80   :  { %943 = vmatpush1.bf16.msra.mxu1 %v1547_v55  ;;  %v1072_v55 = vld [vmem:[%s1869_s4 + $0x40] sm:$0xff] }
  0x81   :  { %1025 = vmatpush1.bf16.msra.mxu0 %v1550_v56  ;;  %944 = vmatprep.subr.bf16.mxu1 %v1555_v57  ;;  %v1073_v56 = vld [vmem:[%s1869_s4 + $0x48] sm:$0xff]  ;;  %v1090_v57 = vld [vmem:[%s1869_s4 + $0xd0] sm:$0xff] }
  0x82   :  { %1026 = vmatprep.subr.bf16.mxu0 %v1558_v58  ;;  %v1091_v58 = vld [vmem:[%s1869_s4 + $0xd8] sm:$0xff] }
  0x84   :  { %945 = vmatpush1.bf16.msra.mxu1 %v1553_v59  ;;  %v1375_v59 = vpack.c.bf16 %v1073_v56, %v1072_v55 }
  0x85   :  { %1027 = vmatpush1.bf16.msra.mxu0 %v1556_v60  ;;  %946 = vmatprep.subr.bf16.mxu1 %v1561_v61  ;;  %v1377_v60 = vpack.c.bf16 %v1091_v58, %v1090_v57  ;;  %v1074_v61 = vld [vmem:[%s1869_s4 + $0x50] sm:$0xff] }
  0x86   :  { %1028 = vmatprep.subr.bf16.mxu0 %v1564_v62  ;;  %v1075_v62 = vld [vmem:[%s1869_s4 + $0x58] sm:$0xff] }
  0x88   :  { %947 = vmatpush1.bf16.msra.mxu1 %v1559_v63  ;;  %v1379_v63 = vpack.c.bf16 %v1075_v62, %v1074_v61 }
  0x89   :  { %1029 = vmatpush1.bf16.msra.mxu0 %v1562_v0  ;;  %948 = vmatprep.subr.bf16.mxu1 %v1567_v1  ;;  %v1092_v0 = vld [vmem:[%s1869_s4 + $0xe0] sm:$0xff]  ;;  %v1093_v1 = vld [vmem:[%s1869_s4 + $0xe8] sm:$0xff] }
  0x8a   :  { %1030 = vmatprep.subr.bf16.mxu0 %v1570_v2  ;;  %v1381_v2 = vpack.c.bf16 %v1093_v1, %v1092_v0 }
  0x8c   :  { %949 = vmatpush1.bf16.msra.mxu1 %v1565_v3  ;;  %v1076_v3 = vld [vmem:[%s1869_s4 + $0x60] sm:$0xff] }
  0x8d   :  { %1031 = vmatpush1.bf16.msra.mxu0 %v1568_v4  ;;  %950 = vmatprep.subr.bf16.mxu1 %v1573_v5  ;;  %v1077_v4 = vld [vmem:[%s1869_s4 + $0x68] sm:$0xff] }
  0x8e   :  { %1032 = vmatprep.subr.bf16.mxu0 %v1576_v6  ;;  %v1383_v5 = vpack.c.bf16 %v1077_v4, %v1076_v3  ;;  %v1094_v6 = vld [vmem:[%s1869_s4 + $0xf0] sm:$0xff] }
  0x90   :  { %951 = vmatpush1.bf16.msra.mxu1 %v1571_v7  ;;  %v1095_v7 = vld [vmem:[%s1869_s4 + $0xf8] sm:$0xff] }
  0x91   :  { %1033 = vmatpush1.bf16.msra.mxu0 %v1574_v8  ;;  %952 = vmatprep.subr.bf16.mxu1 %v1579_v9  ;;  %v1385_v8 = vpack.c.bf16 %v1095_v7, %v1094_v6  ;;  %v1078_v9 = vld [vmem:[%s1869_s4 + $0x70] sm:$0xff] }
  0x92   :  { %1034 = vmatprep.subr.bf16.mxu0 %v1582_v10  ;;  %v1079_v10 = vld [vmem:[%s1869_s4 + $0x78] sm:$0xff] }
  0x94   :  { %953 = vmatpush1.bf16.msra.mxu1 %v1577_v11  ;;  %v1387_v11 = vpack.c.bf16 %v1079_v10, %v1078_v9 }
  0x95   :  { %1035 = vmatpush1.bf16.msra.mxu0 %v1580_v12  ;;  %954 = vmatprep.subr.bf16.mxu1 %v1585_v13  ;;  %v239_v12 = vsub.s32 0, %v1719_v43  ;;  %v235_v13 = vld [vmem:[%s1868_s3] sm:$0x3] }
  0x96   :  { %1036 = vmatprep.subr.bf16.mxu0 %v1588_v16  ;;  %v243_v16 = vsub.s32 1, %v1719_v43 }
  0x98   :  { %955 = vmatpush1.bf16.msra.mxu1 %v1583_v17  ;;  %v240_v17 = vrot.slane %v235_v13, %v239_v12 }
  0x99   :  { %1037 = vmatpush1.bf16.msra.mxu0 %v1586_v18  ;;  %956 = vmatprep.subr.bf16.mxu1 %v1591_v19  ;;  %v244_v18 = vrot.slane %v235_v13, %v243_v16 }
  0x9a   :  { %1038 = vmatprep.subr.bf16.mxu0 %v1594_v20 }
  0x9c   :  { %957 = vmatpush1.bf16.msra.mxu1 %v1589_v21 }
  0x9d   :  { %1039 = vmatpush1.bf16.msra.mxu0 %v1592_v22  ;;  %958 = vmatprep.subr.bf16.mxu1 %v1597_v23 }
  0x9e   :  { %1040 = vmatprep.subr.bf16.mxu0 %v1600_v24 }
  0xa0   :  { %959 = vmatpush1.bf16.msra.mxu1 %v1595_v27 }
  0xa1   :  { %1041 = vmatpush1.bf16.msra.mxu0 %v1598_v28  ;;  %1358 = vmatprep.subr.bf16.mxu1 %v1357_v29 }
  0xa3   :  { %961 = vmatmul.mubr.bf16.vlgmr.msra.gmra.mrb[0].mxu1 %v101_v34 }
  0xa4   :  { %1043 = vmatmul.mubr.bf16.vlgmr.msra.gmra.mrb[0].mxu0 %v105_v35  ;;  %1360 = vmatpush3.bf16.msra.mxu1 %v1359_v36  ;;  %v1096_v36 = vld [vmem:[%s1870_s5] sm:$0x1] }
  0xa5   :  { %1362 = vmatprep.subr.bf16.mxu1 %v1361_v37  ;;  %v1098_v37 = vld [vmem:[%s1870_s5 + $0x1] sm:$0x1]  ;;  %v1097_v38 = vmul.f32 %v1096_v36, %v1058_v33 }
  0xa6   :  { %v1099_v39 = vmul.f32 %v1098_v37, %v1059_v32 }
  0xa8   :  { %1364 = vmatpush3.bf16.msra.mxu1 %v1363_v40  ;;  %v1100_v14 = vadd.f32 %v1099_v39, %v1097_v38 }
  0xa9   :  { %1366 = vmatprep.subr.bf16.mxu1 %v1365_v41 }
  0xaa   :  { %v1104_v40 = vrot.slane %v1100_v14, %v239_v12 }
  0xac   :  { %1368 = vmatpush3.bf16.msra.mxu1 %v1367_v47 }
  0xad   :  { %1370 = vmatprep.subr.bf16.mxu1 %v1369_v48 }
  0xb0   :  { %1372 = vmatpush3.bf16.msra.mxu1 %v1371_v53 }
  0xb1   :  { %1374 = vmatprep.subr.bf16.mxu1 %v1373_v54 }
  0xb4   :  { %1376 = vmatpush3.bf16.msra.mxu1 %v1375_v59 }
  0xb5   :  { %1378 = vmatprep.subr.bf16.mxu1 %v1377_v60 }
  0xb8   :  { %1380 = vmatpush3.bf16.msra.mxu1 %v1379_v63 }
  0xb9   :  { %1382 = vmatprep.subr.bf16.mxu1 %v1381_v2 }
  0xbc   :  { %1384 = vmatpush3.bf16.msra.mxu1 %v1383_v5 }
  0xbd   :  { %1386 = vmatprep.subr.bf16.mxu1 %v1385_v8 }
  0xc0   :  { %1388 = vmatpush3.bf16.msra.mxu1 %v1387_v11 }
 0x176   :  { %v962_v19 = vpop.f32.mrb[0].mxu1 }
 0x177   :  { %v1044_v20 = vpop.f32.mrb[0].mxu0  ;;  %v1389_v21 = vadd.f32 %v962_v19, %v240_v17  ;;  %v964_v22 = vpop.f32.mrb[1].mxu1 }
 0x178   :  { %v1046_v23 = vpop.f32.mrb[1].mxu0  ;;  %v1391_v24 = vadd.f32 %v964_v22, %v244_v18  ;;  %v966_v25 = vpop.f32.mrb[2].mxu1 }
 0x179   :  { %v1048_v26 = vpop.f32.mrb[2].mxu0  ;;  %v1390_v27 = vadd.f32 %v1389_v21, %v1044_v20  ;;  %v967_v28 = vpop.f32.mrb[3].mxu1 }
 0x17a   :  { %v1049_v29 = vpop.f32.mrb[3].mxu0  ;;  %v1392_v30 = vadd.f32 %v1391_v24, %v1046_v23 }
 0x17b   :  { %v1051_v31 = vmax.f32 %v1390_v27, 0.0 }
 0x17c   :  { %v1052_v43 = vmax.f32 %v1392_v30, 0.0 }
 0x17d   :  { %v1062_v35 = vmul.f32 %v1058_v33, %v1051_v31 }
 0x17e   :  { %v1063_v34 = vmul.f32 %v1059_v32, %v1052_v43 }
 0x180   :  { %1169 = vmatprep.mubr.f32.mxu1 %v1063_v34 }
 0x181   :  { %1170 = vmatmul.mubr.f32.vlgmr.msra.gmra.mrb[4].mxu1 %v1062_v35 }
 0x254   :  { %v1354_v15 = vpop.f32.mrb[4].mxu1 }
 0x255   :  { %v1355_v41 = vpop.f32.mrb[5].mxu1 }
 0x256   :  { %v1356_v42 = vadd.f32 %v1355_v41, %v1354_v15 }
 0x258   :  { %v1172_v44 = vadd.f32 %v1356_v42, %v1104_v40 }
 0x25a   :  { %1176 = vst.msk [vmem:[#allocation7] sm:$0x3] %vm1175_vm0, %v1172_v44 }
 0x25b   :  { %1646 = shalt.err (!%p1643_p3)
}
 0x25c   :  { %s1647_s12 = scalar_lea.hbm %s1871_s6, 32 }
 0x25d   :  { %p1648_p4 = scmp.ne.s32.totalorder %s1871_s6, %s1647_s12  ;;  %p1651_p5 = scmp.lt.u32.totalorder %s1647_s12, %s1871_s6 }
 0x25f   :  { %p1653_p6 = pnand %p1651_p5, %p1648_p4 }
 0x261   :  { %1656 = shalt.err (!%p1653_p6)
}
 0x262   :  { %1186 = dma.vmem_to_hbm [thread:$0]  %s1184_s9, 32, %s1871_s6, [#allocation4]  }
 0x263   :  { %1661 = dma.done.wait [#allocation4], 32  }
 0x264   :  { %1662 = vsyncadd [#allocation4], 4294967264 }
 0x265   :  { %1190 = vsyncpa [#allocation3], 1 }
 0x266   :  { %1191 = vsyncpa [#allocation4], 1 }
 0x267   :  { %1192 = vsyncpa [#allocation5], 1 }

</bundles_post_ra>
